<compile_context>
chip_gen: v5e
topology: v5e:2x2
jax: 0.10.0
libtpu: 0.0.40
codegen_flags: <defaults>
</compile_context>

<pallas_src>
import jax
import jax.numpy as jnp
from jax.experimental import pallas as pl
from jax.experimental.pallas import tpu as pltpu


def _round_up(x, m):
    return ((x + m - 1) // m) * m


def _cdiv(a, b):
    return -(-a // b)


def _make_linear_kernel(f_total, tk, resident_w, use_scratch):
    has_tail = (f_total % tk) != 0

    def kernel(x_ref, w_ref, b_ref, o_ref, *scratch):
        # x_ref : (tm, tk)        activation tile (un-padded HBM array)
        # w_ref : (tk, Cp) or (Fk, Cp) pre-transposed weight (zero-padded)
        # b_ref : (1, Cp)         zero-padded bias (resident)
        # o_ref : (tm, Cp)        lane-dense output tile, resident across k
        k = pl.program_id(1)
        acc_ref = scratch[0] if use_scratch else o_ref

        @pl.when(k == 0)
        def _():
            acc_ref[...] = jnp.zeros_like(acc_ref)

        x = x_ref[...]
        if has_tail:
            # Feature-axis tail of the *un-padded* activation: edge-block lanes
            # beyond F contain garbage -> force them to exact zero.
            col = jax.lax.broadcasted_iota(jnp.int32, x.shape, 1)
            x = jnp.where(col + k * tk < f_total, x, jnp.zeros_like(x))

        if resident_w:
            off = pl.multiple_of(k * tk, tk)
            w = w_ref[pl.ds(off, tk), :]
        else:
            w = w_ref[...]

        acc_ref[...] += jnp.dot(x, w, preferred_element_type=jnp.float32)

        @pl.when(k == pl.num_programs(1) - 1)
        def _():
            o_ref[...] = (acc_ref[...] + b_ref[...]).astype(o_ref.dtype)

    return kernel


def classifier_forward(features1, weight, bias, *, tm_max=512, tk_max=2048):
    """Equivalent of Classifier.forward.

    features1: (B, ...) -- flattened row-major like torch .view(B, -1)
    weight   : (num_classes, num_features)  torch.nn.Linear layout
    bias     : (num_classes,)
    returns  : (B, num_classes)
    """
    B = features1.shape[0]
    x = features1.reshape(B, -1)                   # glue: view(B, -1); no pad, no copy
    F = x.shape[1]
    C = weight.shape[0]

    out_dtype = x.dtype
    x_size = x.dtype.itemsize
    w_size = weight.dtype.itemsize
    o_size = x_size

    # ---- batch (row) tiling: never pad the activation ----
    row_align = 8 if x_size >= 4 else 16           # sublane packing for sub-32-bit
    if B >= 2 * tm_max:
        tm = tm_max
    else:
        # At least 2 row tiles when possible so v7x's two TensorCores both work.
        tm = max(row_align, _round_up(_cdiv(B, 2), row_align))
        if tm >= B:
            tm = B                                 # single full-extent row tile
    num_i = _cdiv(B, tm)

    # ---- feature (reduction) tiling ----
    if F <= tk_max:
        tk, num_k = F, 1                           # single K step, no masking needed
    else:
        tk, num_k = tk_max, _cdiv(F, tk_max)       # tk_max is a multiple of 128
    Fk = num_k * tk                                # weight rows after (cheap) padding

    Cp = _round_up(C, 128)                         # lane-dense output/class dim

    # One-off pad + transpose of the SMALL weight (classes x features); the big
    # activation tensor is never touched.  In a real model, keep the transposed
    # weight as the stored parameter instead of redoing this per call.
    w_t = jnp.pad(weight, ((0, Cp - C), (0, Fk - F))).T    # (Fk, Cp)
    b_p = jnp.pad(bias, (0, Cp - C)).reshape(1, Cp)

    # Keep the whole (pre-transposed) weight VMEM-resident when it fits so it is
    # streamed from HBM exactly once instead of once per row tile.
    resident_w = (num_k > 1) and (2 * Fk * Cp * w_size <= (24 << 20))

    # f32 outputs accumulate straight into the k-resident output block.
    use_scratch = out_dtype != jnp.float32
    scratch_shapes = [pltpu.VMEM((tm, Cp), jnp.float32)] if use_scratch else []

    if resident_w:
        w_spec = pl.BlockSpec((Fk, Cp), lambda i, k: (0, 0))
        w_vmem = 2 * Fk * Cp * w_size
    else:
        w_spec = pl.BlockSpec((tk, Cp), lambda i, k: (k, 0))
        w_vmem = 2 * tk * Cp * w_size

    vmem_est = (2 * tm * tk * x_size               # x (double-buffered)
                + w_vmem                           # weight
                + 2 * tm * Cp * o_size             # output
                + 2 * Cp * 4                       # bias
                + (tm * Cp * 4 if use_scratch else 0)
                + (tm * tk * x_size if (F % tk) else 0))   # mask temp
    vmem_limit = max(16 << 20, min(vmem_est + (8 << 20), 56 << 20))

    w_reads = 1 if (resident_w or num_k == 1) else num_i
    cost = pl.CostEstimate(
        flops=2 * B * F * Cp,
        transcendentals=0,
        bytes_accessed=B * F * x_size + w_reads * Fk * Cp * w_size + B * Cp * o_size,
    )

    kernel = _make_linear_kernel(F, tk, resident_w, use_scratch)

    out = pl.pallas_call(
        kernel,
        out_shape=jax.ShapeDtypeStruct((B, Cp), out_dtype),
        grid_spec=pltpu.PrefetchScalarGridSpec(
            num_scalar_prefetch=0,
            grid=(num_i, num_k),
            in_specs=[
                pl.BlockSpec((tm, tk), lambda i, k: (i, k)),   # activation tile
                w_spec,                                        # weight
                pl.BlockSpec((1, Cp), lambda i, k: (0, 0)),    # bias (resident)
            ],
            out_specs=pl.BlockSpec((tm, Cp), lambda i, k: (i, 0)),
            scratch_shapes=scratch_shapes,
        ),
        compiler_params=pltpu.CompilerParams(
            dimension_semantics=("parallel", "arbitrary"),
            vmem_limit_bytes=int(vmem_limit)),
        cost_estimate=cost,
    )(x, w_t, b_p)

    return out[:, :C]


def init_classifier_params(key, num_features, num_classes, dtype=jnp.float32):
    """Deterministic init mirroring torch.nn.Linear defaults
    (uniform weight/bias with bound 1/sqrt(fan_in))."""
    kw, kb = jax.random.split(key)
    bound = 1.0 / float(num_features) ** 0.5
    weight = jax.random.uniform(
        kw, (num_classes, num_features), dtype=dtype, minval=-bound, maxval=bound)
    bias = jax.random.uniform(
        kb, (num_classes,), dtype=dtype, minval=-bound, maxval=bound)
    return weight, bias


if __name__ == "__main__":
    key = jax.random.PRNGKey(0)
    k_x, k_p, k_x2, k_p2 = jax.random.split(key, 4)

    # Main check: features1 (B, C, H, W) flattened to num_features, projected
    # to num_classes (matches the module's forward).
    B, C_in, H, W = 2, 4, 16, 16
    num_features = C_in * H * W          # 1024
    num_classes = 10

    features1 = jax.random.normal(k_x, (B, C_in, H, W), dtype=jnp.float32)
    weight, bias = init_classifier_params(k_p, num_features, num_classes)

    out1 = classifier_forward(features1, weight, bias)
    jax.block_until_ready(out1)
    ref1 = features1.reshape(B, -1) @ weight.T + bias
    assert out1.shape == (B, num_classes)
    assert jnp.allclose(out1, ref1, atol=1e-5, rtol=1e-5)

    # Secondary check: exercises multi-K-tile reduction, un-padded feature tail
    # masking, a ragged batch edge tile and the resident-weight path.
    B2, F2, C2 = 10, 300, 10
    x2 = jax.random.normal(k_x2, (B2, F2), dtype=jnp.float32)
    w2, b2 = init_classifier_params(k_p2, F2, C2)
    out2 = classifier_forward(x2, w2, b2, tm_max=512, tk_max=128)
    jax.block_until_ready(out2)
    ref2 = x2 @ w2.T + b2
    assert out2.shape == (B2, C2)
    assert jnp.allclose(out2, ref2, atol=1e-5, rtol=1e-5)

    print("KERNEL_OK")
</pallas_src>

<mosaic_0001>
module attributes {stable_mosaic.version = 11 : i64} {
  func.func @kernel(%arg0: i32, %arg1: i32, %arg2: memref<2x1024xf32, #tpu.memory_space<vmem>>, %arg3: memref<1024x128xf32, #tpu.memory_space<vmem>>, %arg4: memref<1x128xf32, #tpu.memory_space<vmem>>, %arg5: memref<2x128xf32, #tpu.memory_space<vmem>>) attributes {dimension_semantics = [#tpu.dimension_semantics<parallel>, #tpu.dimension_semantics<arbitrary>], iteration_bounds = array<i64: 1, 1>, scalar_prefetch = 0 : i64, scratch_operands = 0 : i64, tpu.core_type = #tpu.core_type<tc>, window_params = [{transform_indices = @transform_0, window_bounds = array<i64: 2, 1024>}, {transform_indices = @transform_1, window_bounds = array<i64: 1024, 128>}, {pipeline_mode = #tpu.pipeline_mode<synchronous>, transform_indices = @transform_2, window_bounds = array<i64: 1, 128>}, {transform_indices = @transform_3, window_bounds = array<i64: 2, 128>}]} {
    %c0_i32 = arith.constant 0 : i32
    %0 = arith.cmpi eq, %arg1, %c0_i32 : i32
    %1 = arith.extui %0 : i1 to i32
    %c0_i32_0 = arith.constant 0 : i32
    %2 = arith.cmpi ne, %1, %c0_i32_0 : i32
    scf.if %2 {
      %cst_10 = arith.constant 0.000000e+00 : f32
      %12 = vector.broadcast %cst_10 : f32 to vector<2x128xf32>
      %c0_11 = arith.constant 0 : index
      %c0_12 = arith.constant 0 : index
      %13 = vector.load %arg5[%c0_11, %c0_12] : memref<2x128xf32, #tpu.memory_space<vmem>>, vector<2x128xf32>
      tpu.vector_store %arg5[%c0_11, %c0_12], %12 {strides = array<i32>} : memref<2x128xf32, #tpu.memory_space<vmem>>, vector<2x128xf32>,
    } else {
    }
    %c0 = arith.constant 0 : index
    %c0_1 = arith.constant 0 : index
    %3 = vector.load %arg2[%c0, %c0_1] : memref<2x1024xf32, #tpu.memory_space<vmem>>, vector<2x1024xf32>
    %c0_2 = arith.constant 0 : index
    %c0_3 = arith.constant 0 : index
    %4 = vector.load %arg3[%c0_2, %c0_3] : memref<1024x128xf32, #tpu.memory_space<vmem>>, vector<1024x128xf32>
    %c0_4 = arith.constant 0 : index
    %c0_5 = arith.constant 0 : index
    %5 = vector.load %arg5[%c0_4, %c0_5] : memref<2x128xf32, #tpu.memory_space<vmem>>, vector<2x128xf32>
    %cst = arith.constant dense<0.000000e+00> : vector<2x128xf32>
    %6 = tpu.matmul %3, %4, %cst {dimension_numbers = #tpu.dot_dimension_numbers<[1], [0], [0], [1], [0, 0, 1, 1], [], []>} : vector<2x1024xf32>, vector<1024x128xf32>, vector<2x128xf32> -> vector<2x128xf32>
    %7 = arith.addf %5, %6 : vector<2x128xf32>
    %c0_6 = arith.constant 0 : index
    %c0_7 = arith.constant 0 : index
    %8 = vector.load %arg5[%c0_6, %c0_7] : memref<2x128xf32, #tpu.memory_space<vmem>>, vector<2x128xf32>
    tpu.vector_store %arg5[%c0_6, %c0_7], %7 {strides = array<i32>} : memref<2x128xf32, #tpu.memory_space<vmem>>, vector<2x128xf32>,
    %c0_i32_8 = arith.constant 0 : i32
    %9 = arith.cmpi eq, %arg1, %c0_i32_8 : i32
    %10 = arith.extui %9 : i1 to i32
    %c0_i32_9 = arith.constant 0 : i32
    %11 = arith.cmpi ne, %10, %c0_i32_9 : i32
    scf.if %11 {
      %c0_10 = arith.constant 0 : index
      %c0_11 = arith.constant 0 : index
      %12 = vector.load %arg5[%c0_10, %c0_11] : memref<2x128xf32, #tpu.memory_space<vmem>>, vector<2x128xf32>
      %c0_12 = arith.constant 0 : index
      %c0_13 = arith.constant 0 : index
      %13 = vector.load %arg4[%c0_12, %c0_13] : memref<1x128xf32, #tpu.memory_space<vmem>>, vector<1x128xf32>
      %14 = vector.broadcast %13 : vector<1x128xf32> to vector<2x128xf32>
      %15 = arith.addf %12, %14 : vector<2x128xf32>
      %c0_14 = arith.constant 0 : index
      %c0_15 = arith.constant 0 : index
      %16 = vector.load %arg5[%c0_14, %c0_15] : memref<2x128xf32, #tpu.memory_space<vmem>>, vector<2x128xf32>
      tpu.vector_store %arg5[%c0_14, %c0_15], %15 {strides = array<i32>} : memref<2x128xf32, #tpu.memory_space<vmem>>, vector<2x128xf32>,
    } else {
    }
    return
  }
  func.func @transform_0(%arg0: i32, %arg1: i32) -> (i32, i32) {
    %c0_i32 = arith.constant 0 : i32
    return %arg0, %arg1 : i32, i32
  }
  func.func @transform_1(%arg0: i32, %arg1: i32) -> (i32, i32) {
    %c0_i32 = arith.constant 0 : i32
    %c0_i32_0 = arith.constant 0 : i32
    return %arg1, %c0_i32 : i32, i32
  }
  func.func @transform_2(%arg0: i32, %arg1: i32) -> (i32, i32) {
    %c0_i32 = arith.constant 0 : i32
    %c0_i32_0 = arith.constant 0 : i32
    %c0_i32_1 = arith.constant 0 : i32
    return %c0_i32, %c0_i32_0 : i32, i32
  }
  func.func @transform_3(%arg0: i32, %arg1: i32) -> (i32, i32) {
    %c0_i32 = arith.constant 0 : i32
    %c0_i32_0 = arith.constant 0 : i32
    return %arg0, %c0_i32 : i32, i32
  }
}

</mosaic_0001>

<bundles_post_ra>
// kernel: tpu_custom_call.1
= control target key start
LH: loop header
LB: loop body
LE: loop exit
PB: predicated region body
PF: predicated region fallthrough
CT: control target
= control target key end

     0   :  { %8 = vsyncpa [#allocation3], 0  ;;  %s515_s0 = inlined_call_operand.hbm [shape: f32[2,1024], index: 0, kind: input, shape index: {}]   ;;  %s516_s1 = inlined_call_operand.hbm [shape: f32[1024,128], index: 1, kind: input, shape index: {}]   ;;  %s517_s2 = inlined_call_operand.vmem [shape: f32[1,128], index: 2, kind: input, shape index: {}]   ;;  %s518_s3 = inlined_call_operand.hbm [shape: f32[2,128], index: 3, kind: output, shape index: {}]  }
   0x1   :  { %9 = vsyncpa [#allocation6], 0 }
   0x2   :  { %10 = vsyncpa [#allocation4], 0  ;;  %s16_s14 = sshll.u32 %s515_s0, 4  ;;  %s477_s15 = smov [#allocation2]   ;;  %s17_s14 = int_to_ptr.hbm [resolvable:$true] %s16_s14 }
   0x3   :  { %s18_s16 = sshll.u32 %s477_s15, 4  ;;  %s26_s19 = sshll.u32 %s516_s1, 4  ;;  %s19_s16 = int_to_ptr.vmem [resolvable:$true] %s18_s16  ;;  %s27_s19 = int_to_ptr.hbm [resolvable:$true] %s26_s19 }
   0x4   :  { %21 = dma.hbm_to_vmem [thread:$0]  %s17_s14, 256, %s19_s16, [#allocation3]  }
   0x5   :  { %s478_s20 = smov [#allocation5]   ;;  %s479_s22 = smov 128  }
   0x6   :  { %s28_s21 = sshll.u32 %s478_s20, 4  ;;  %s480_s23 = smov 8   ;;  %s29_s21 = int_to_ptr.vmem [resolvable:$true] %s28_s21 }
   0x7   :  { %34 = dma.hbm_to_vmem [thread:$0]  %s27_s19, 16384, %s29_s21, [#allocation6], %s479_s22, %s479_s22, %s480_s23  }
   0x8   :  { %471 = dma.done.wait [#allocation3], 256  }
   0x9   :  { %472 = vsyncadd [#allocation3], 4294967040 }
   0xa   :  { %473 = dma.done.wait [#allocation6], 16384  }
   0xb   :  { %474 = vsyncadd [#allocation6], 4294950912  ;;  %v67_v0 = vld [vmem:[#allocation5 + $0x78] sm:$0xff]  ;;  %v66_v2 = vld [vmem:[#allocation5 + $0x70] sm:$0xff]  ;;  %s482_s24 = smov [#allocation7]   ;;  %s381_s28 = sshll.u32 %s518_s3, 4  ;;  %s382_s28 = int_to_ptr.hbm [resolvable:$true] %s381_s28 }
   0xc   :  { %v99_v1 = vld [vmem:[#allocation5 + $0x178] sm:$0xff]  ;;  %202 = vmatpush.msra.mxu0 %v67_v0  ;;  %v98_v4 = vld [vmem:[#allocation5 + $0x170] sm:$0xff]  ;;  %v65_v6 = vld [vmem:[#allocation5 + $0x68] sm:$0xff]  ;;  %s379_s25 = sshll.u32 %s482_s24, 4  ;;  %s380_s25 = int_to_ptr.vmem [resolvable:$true] %s379_s25 }
   0xd   :  { %242 = vmatpush.msra.mxu2 %v99_v1  ;;  %v83_v3 = vld [vmem:[#allocation5 + $0xf8] sm:$0xff]  ;;  %v82_v7 = vld [vmem:[#allocation5 + $0xf0] sm:$0xff]  ;;  %v97_v8 = vld [vmem:[#allocation5 + $0x168] sm:$0xff] }
   0xe   :  { %v115_v5 = vld [vmem:[#allocation5 + $0x1f8] sm:$0xff]  ;;  %222 = vmatpush.msra.mxu1 %v83_v3  ;;  %203 = vmatpush.msra.mxu0 %v66_v2  ;;  %v114_v9 = vld [vmem:[#allocation5 + $0x1f0] sm:$0xff]  ;;  %v81_v10 = vld [vmem:[#allocation5 + $0xe8] sm:$0xff] }
   0xf   :  { %262 = vmatpush.msra.mxu3 %v115_v5  ;;  %243 = vmatpush.msra.mxu2 %v98_v4  ;;  %v64_v11 = vld [vmem:[#allocation5 + $0x60] sm:$0xff]  ;;  %v113_v13 = vld [vmem:[#allocation5 + $0x1e8] sm:$0xff]  ;;  %v63_v16 = vld [vmem:[#allocation5 + $0x58] sm:$0xff] }
  0x10   :  { %223 = vmatpush.msra.mxu1 %v82_v7  ;;  %v96_v12 = vld [vmem:[#allocation5 + $0x160] sm:$0xff]  ;;  %204 = vmatpush.msra.mxu0 %v65_v6  ;;  %v95_v17 = vld [vmem:[#allocation5 + $0x158] sm:$0xff]  ;;  %v62_v20 = vld [vmem:[#allocation5 + $0x50] sm:$0xff] }
  0x11   :  { %263 = vmatpush.msra.mxu3 %v114_v9  ;;  %244 = vmatpush.msra.mxu2 %v97_v8  ;;  %v80_v14 = vld [vmem:[#allocation5 + $0xe0] sm:$0xff]  ;;  %v79_v18 = vld [vmem:[#allocation5 + $0xd8] sm:$0xff]  ;;  %v94_v21 = vld [vmem:[#allocation5 + $0x150] sm:$0xff] }
  0x12   :  { %v112_v15 = vld [vmem:[#allocation5 + $0x1e0] sm:$0xff]  ;;  %224 = vmatpush.msra.mxu1 %v81_v10  ;;  %205 = vmatpush.msra.mxu0 %v64_v11  ;;  %v111_v19 = vld [vmem:[#allocation5 + $0x1d8] sm:$0xff]  ;;  %v78_v22 = vld [vmem:[#allocation5 + $0xd0] sm:$0xff] }
  0x13   :  { %264 = vmatpush.msra.mxu3 %v113_v13  ;;  %245 = vmatpush.msra.mxu2 %v96_v12  ;;  %v110_v23 = vld [vmem:[#allocation5 + $0x1d0] sm:$0xff]  ;;  %v61_v24 = vld [vmem:[#allocation5 + $0x48] sm:$0xff]  ;;  %v60_v28 = vld [vmem:[#allocation5 + $0x40] sm:$0xff] }
  0x14   :  { %225 = vmatpush.msra.mxu1 %v80_v14  ;;  %206 = vmatpush.msra.mxu0 %v63_v16  ;;  %v93_v25 = vld [vmem:[#allocation5 + $0x148] sm:$0xff]  ;;  %v92_v29 = vld [vmem:[#allocation5 + $0x140] sm:$0xff]  ;;  %v59_v32 = vld [vmem:[#allocation5 + $0x38] sm:$0xff] }
  0x15   :  { %265 = vmatpush.msra.mxu3 %v112_v15  ;;  %246 = vmatpush.msra.mxu2 %v95_v17  ;;  %v77_v26 = vld [vmem:[#allocation5 + $0xc8] sm:$0xff]  ;;  %v76_v30 = vld [vmem:[#allocation5 + $0xc0] sm:$0xff]  ;;  %v91_v33 = vld [vmem:[#allocation5 + $0x138] sm:$0xff] }
  0x16   :  { %226 = vmatpush.msra.mxu1 %v79_v18  ;;  %207 = vmatpush.msra.mxu0 %v62_v20  ;;  %v109_v27 = vld [vmem:[#allocation5 + $0x1c8] sm:$0xff]  ;;  %v108_v31 = vld [vmem:[#allocation5 + $0x1c0] sm:$0xff]  ;;  %v75_v34 = vld [vmem:[#allocation5 + $0xb8] sm:$0xff] }
  0x17   :  { %266 = vmatpush.msra.mxu3 %v111_v19  ;;  %247 = vmatpush.msra.mxu2 %v94_v21  ;;  %v107_v35 = vld [vmem:[#allocation5 + $0x1b8] sm:$0xff]  ;;  %v58_v36 = vld [vmem:[#allocation5 + $0x30] sm:$0xff]  ;;  %v57_v40 = vld [vmem:[#allocation5 + $0x28] sm:$0xff] }
  0x18   :  { %227 = vmatpush.msra.mxu1 %v78_v22  ;;  %208 = vmatpush.msra.mxu0 %v61_v24  ;;  %v90_v37 = vld [vmem:[#allocation5 + $0x130] sm:$0xff]  ;;  %v89_v41 = vld [vmem:[#allocation5 + $0x128] sm:$0xff]  ;;  %v56_v44 = vld [vmem:[#allocation5 + $0x20] sm:$0xff] }
  0x19   :  { %267 = vmatpush.msra.mxu3 %v110_v23  ;;  %248 = vmatpush.msra.mxu2 %v93_v25  ;;  %v74_v38 = vld [vmem:[#allocation5 + $0xb0] sm:$0xff]  ;;  %v73_v42 = vld [vmem:[#allocation5 + $0xa8] sm:$0xff]  ;;  %v88_v45 = vld [vmem:[#allocation5 + $0x120] sm:$0xff] }
  0x1a   :  { %228 = vmatpush.msra.mxu1 %v77_v26  ;;  %209 = vmatpush.msra.mxu0 %v60_v28  ;;  %v106_v39 = vld [vmem:[#allocation5 + $0x1b0] sm:$0xff]  ;;  %v105_v43 = vld [vmem:[#allocation5 + $0x1a8] sm:$0xff]  ;;  %v72_v46 = vld [vmem:[#allocation5 + $0xa0] sm:$0xff] }
  0x1b   :  { %268 = vmatpush.msra.mxu3 %v109_v27  ;;  %249 = vmatpush.msra.mxu2 %v92_v29  ;;  %v104_v47 = vld [vmem:[#allocation5 + $0x1a0] sm:$0xff]  ;;  %v55_v48 = vld [vmem:[#allocation5 + $0x18] sm:$0xff]  ;;  %v54_v52 = vld [vmem:[#allocation5 + $0x10] sm:$0xff] }
  0x1c   :  { %229 = vmatpush.msra.mxu1 %v76_v30  ;;  %210 = vmatpush.msra.mxu0 %v59_v32  ;;  %v87_v49 = vld [vmem:[#allocation5 + $0x118] sm:$0xff]  ;;  %v86_v53 = vld [vmem:[#allocation5 + $0x110] sm:$0xff]  ;;  %v53_v56 = vld [vmem:[#allocation5 + $0x8] sm:$0xff] }
  0x1d   :  { %269 = vmatpush.msra.mxu3 %v108_v31  ;;  %250 = vmatpush.msra.mxu2 %v91_v33  ;;  %v71_v50 = vld [vmem:[#allocation5 + $0x98] sm:$0xff]  ;;  %v70_v54 = vld [vmem:[#allocation5 + $0x90] sm:$0xff]  ;;  %v85_v57 = vld [vmem:[#allocation5 + $0x108] sm:$0xff] }
  0x1e   :  { %230 = vmatpush.msra.mxu1 %v75_v34  ;;  %211 = vmatpush.msra.mxu0 %v58_v36  ;;  %v103_v51 = vld [vmem:[#allocation5 + $0x198] sm:$0xff]  ;;  %v102_v55 = vld [vmem:[#allocation5 + $0x190] sm:$0xff]  ;;  %v69_v58 = vld [vmem:[#allocation5 + $0x88] sm:$0xff] }
  0x1f   :  { %270 = vmatpush.msra.mxu3 %v107_v35  ;;  %251 = vmatpush.msra.mxu2 %v90_v37  ;;  %v101_v59 = vld [vmem:[#allocation5 + $0x188] sm:$0xff]  ;;  %v52_v60 = vld [vmem:[#allocation5] sm:$0xff]  ;;  %v131_v62 = vld [vmem:[#allocation5 + $0x278] sm:$0xff] }
  0x20   :  { %231 = vmatpush.msra.mxu1 %v74_v38  ;;  %212 = vmatpush.msra.mxu0 %v57_v40  ;;  %v84_v61 = vld [vmem:[#allocation5 + $0x100] sm:$0xff]  ;;  %v163_v63 = vld [vmem:[#allocation5 + $0x378] sm:$0xff]  ;;  %v130_v2 = vld [vmem:[#allocation5 + $0x270] sm:$0xff] }
  0x21   :  { %271 = vmatpush.msra.mxu3 %v106_v39  ;;  %252 = vmatpush.msra.mxu2 %v89_v41  ;;  %v68_v0 = vld [vmem:[#allocation5 + $0x80] sm:$0xff]  ;;  %v147_v3 = vld [vmem:[#allocation5 + $0x2f8] sm:$0xff]  ;;  %v162_v4 = vld [vmem:[#allocation5 + $0x370] sm:$0xff] }
  0x22   :  { %232 = vmatpush.msra.mxu1 %v73_v42  ;;  %213 = vmatpush.msra.mxu0 %v56_v44  ;;  %v100_v1 = vld [vmem:[#allocation5 + $0x180] sm:$0xff]  ;;  %v179_v5 = vld [vmem:[#allocation5 + $0x3f8] sm:$0xff]  ;;  %v129_v6 = vld [vmem:[#allocation5 + $0x268] sm:$0xff] }
  0x23   :  { %272 = vmatpush.msra.mxu3 %v105_v43  ;;  %253 = vmatpush.msra.mxu2 %v88_v45  ;;  %v146_v7 = vld [vmem:[#allocation5 + $0x2f0] sm:$0xff]  ;;  %v161_v8 = vld [vmem:[#allocation5 + $0x368] sm:$0xff]  ;;  %v128_v10 = vld [vmem:[#allocation5 + $0x260] sm:$0xff] }
  0x24   :  { %233 = vmatpush.msra.mxu1 %v72_v46  ;;  %214 = vmatpush.msra.mxu0 %v55_v48  ;;  %v178_v9 = vld [vmem:[#allocation5 + $0x3f0] sm:$0xff]  ;;  %v145_v11 = vld [vmem:[#allocation5 + $0x2e8] sm:$0xff]  ;;  %v160_v13 = vld [vmem:[#allocation5 + $0x360] sm:$0xff] }
  0x25   :  { %273 = vmatpush.msra.mxu3 %v104_v47  ;;  %254 = vmatpush.msra.mxu2 %v87_v49  ;;  %v50_v12 = vld [vmem:[#allocation2] sm:$0xff]  ;;  %v177_v14 = vld [vmem:[#allocation5 + $0x3e8] sm:$0xff]  ;;  %v127_v15 = vld [vmem:[#allocation5 + $0x258] sm:$0xff] }
  0x26   :  { %234 = vmatpush.msra.mxu1 %v71_v50  ;;  %215 = vmatpush.msra.mxu0 %v54_v52  ;;  %183 = vst [vmem:[#allocation1] ss:$4 sm:$0xff] %v50_v12  ;;  %v144_v16 = vld [vmem:[#allocation5 + $0x2e0] sm:$0xff]  ;;  %v159_v17 = vld [vmem:[#allocation5 + $0x358] sm:$0xff]  ;;  %v126_v19 = vld [vmem:[#allocation5 + $0x250] sm:$0xff] }
  0x27   :  { %274 = vmatpush.msra.mxu3 %v103_v51  ;;  %255 = vmatpush.msra.mxu2 %v86_v53  ;;  %v176_v18 = vld [vmem:[#allocation5 + $0x3e0] sm:$0xff]  ;;  %v143_v20 = vld [vmem:[#allocation5 + $0x2d8] sm:$0xff]  ;;  %v158_v21 = vld [vmem:[#allocation5 + $0x350] sm:$0xff] }
  0x28   :  { %235 = vmatpush.msra.mxu1 %v70_v54  ;;  %216 = vmatpush.msra.mxu0 %v53_v56  ;;  %v175_v22 = vld [vmem:[#allocation5 + $0x3d8] sm:$0xff]  ;;  %v125_v23 = vld [vmem:[#allocation5 + $0x248] sm:$0xff]  ;;  %v142_v24 = vld [vmem:[#allocation5 + $0x2d0] sm:$0xff] }
  0x29   :  { %275 = vmatpush.msra.mxu3 %v102_v55  ;;  %256 = vmatpush.msra.mxu2 %v85_v57  ;;  %v157_v25 = vld [vmem:[#allocation5 + $0x348] sm:$0xff]  ;;  %v174_v26 = vld [vmem:[#allocation5 + $0x3d0] sm:$0xff]  ;;  %v51_v27 = vld [vmem:[#allocation2 + $0x8] sm:$0xff] }
  0x2a   :  { %236 = vmatpush.msra.mxu1 %v69_v58  ;;  %217 = vmatpush.msra.mxu0 %v52_v60  ;;  %v124_v28 = vld [vmem:[#allocation5 + $0x240] sm:$0xff]  ;;  %v141_v29 = vld [vmem:[#allocation5 + $0x2c8] sm:$0xff]  ;;  %v123_v32 = vld [vmem:[#allocation5 + $0x238] sm:$0xff]  ;;  %185 = vst [vmem:[#allocation1 + $0x20] ss:$4 sm:$0xff] %v51_v27 }
  0x2b   :  { %276 = vmatpush.msra.mxu3 %v101_v59  ;;  %257 = vmatpush.msra.mxu2 %v84_v61  ;;  %v156_v30 = vld [vmem:[#allocation5 + $0x340] sm:$0xff]  ;;  %v173_v31 = vld [vmem:[#allocation5 + $0x3c8] sm:$0xff]  ;;  %v155_v34 = vld [vmem:[#allocation5 + $0x338] sm:$0xff] }
  0x2c   :  { %282 = vmatpush.msrb.mxu0 %v131_v62  ;;  %237 = vmatpush.msra.mxu1 %v68_v0  ;;  %v140_v33 = vld [vmem:[#allocation5 + $0x2c0] sm:$0xff]  ;;  %v122_v36 = vld [vmem:[#allocation5 + $0x230] sm:$0xff]  ;;  %v139_v37 = vld [vmem:[#allocation5 + $0x2b8] sm:$0xff] }
  0x2d   :  { %322 = vmatpush.msrb.mxu2 %v163_v63  ;;  %277 = vmatpush.msra.mxu3 %v100_v1  ;;  %v172_v35 = vld [vmem:[#allocation5 + $0x3c0] sm:$0xff]  ;;  %v154_v38 = vld [vmem:[#allocation5 + $0x330] sm:$0xff]  ;;  %v171_v39 = vld [vmem:[#allocation5 + $0x3b8] sm:$0xff] }
  0x2e   :  { %283 = vmatpush.msrb.mxu0 %v130_v2  ;;  %302 = vmatpush.msrb.mxu1 %v147_v3  ;;  %v121_v40 = vld [vmem:[#allocation5 + $0x228] sm:$0xff]  ;;  %v138_v41 = vld [vmem:[#allocation5 + $0x2b0] sm:$0xff]  ;;  %v188_v44 = vld.sshfl [vmem:[#allocation1 + $0x10] sm:$0xff pattern:$0x73625140] }
  0x2f   :  { %323 = vmatpush.msrb.mxu2 %v162_v4  ;;  %342 = vmatpush.msrb.mxu3 %v179_v5  ;;  %v153_v42 = vld [vmem:[#allocation5 + $0x328] sm:$0xff]  ;;  %v170_v43 = vld [vmem:[#allocation5 + $0x3b0] sm:$0xff]  ;;  %v120_v45 = vld [vmem:[#allocation5 + $0x220] sm:$0xff] }
  0x30   :  { %284 = vmatpush.msrb.mxu0 %v129_v6  ;;  %303 = vmatpush.msrb.mxu1 %v146_v7  ;;  %v137_v46 = vld [vmem:[#allocation5 + $0x2a8] sm:$0xff]  ;;  %v152_v47 = vld [vmem:[#allocation5 + $0x320] sm:$0xff]  ;;  %v119_v51 = vld [vmem:[#allocation5 + $0x218] sm:$0xff] }
  0x31   :  { %324 = vmatpush.msrb.mxu2 %v161_v8  ;;  %343 = vmatpush.msrb.mxu3 %v178_v9  ;;  %v169_v48 = vld [vmem:[#allocation5 + $0x3a8] sm:$0xff]  ;;  %v189_v50 = vld.sshfl [vmem:[#allocation1 + $0x18] sm:$0xff pattern:$0x73625140]  ;;  %v151_v53 = vld [vmem:[#allocation5 + $0x318] sm:$0xff] }
  0x32   :  { %285 = vmatpush.msrb.mxu0 %v128_v10  ;;  %304 = vmatpush.msrb.mxu1 %v145_v11  ;;  %v186_v49 = vld.sshfl [vmem:[#allocation1] sm:$0xff pattern:$0x73625140]  ;;  %v136_v52 = vld [vmem:[#allocation5 + $0x2a0] sm:$0xff]  ;;  %v118_v56 = vld [vmem:[#allocation5 + $0x210] sm:$0xff]  ;;  %v481_v10 = vmov 0.0  }
  0x33   :  { %325 = vmatpush.msrb.mxu2 %v160_v13  ;;  %344 = vmatpush.msrb.mxu3 %v177_v14  ;;  %v168_v54 = vld [vmem:[#allocation5 + $0x3a0] sm:$0xff]  ;;  %v187_v55 = vld.sshfl [vmem:[#allocation1 + $0x8] sm:$0xff pattern:$0x73625140]  ;;  %v135_v57 = vld [vmem:[#allocation5 + $0x298] sm:$0xff] }
  0x34   :  { %286 = vmatpush.msrb.mxu0 %v127_v15  ;;  %305 = vmatpush.msrb.mxu1 %v144_v16  ;;  %v150_v58 = vld [vmem:[#allocation5 + $0x310] sm:$0xff]  ;;  %v167_v59 = vld [vmem:[#allocation5 + $0x398] sm:$0xff]  ;;  %v117_v60 = vld [vmem:[#allocation5 + $0x208] sm:$0xff]  ;;  %49 = vst [vmem:[#allocation7] sm:$0x3] %v481_v10 }
  0x35   :  { %326 = vmatpush.msrb.mxu2 %v159_v17  ;;  %345 = vmatpush.msrb.mxu3 %v176_v18  ;;  %v134_v61 = vld [vmem:[#allocation5 + $0x290] sm:$0xff]  ;;  %v149_v62 = vld [vmem:[#allocation5 + $0x308] sm:$0xff]  ;;  %v116_v0 = vld [vmem:[#allocation5 + $0x200] sm:$0xff] }
  0x36   :  { %287 = vmatpush.msrb.mxu0 %v126_v19  ;;  %306 = vmatpush.msrb.mxu1 %v143_v20  ;;  %v166_v63 = vld [vmem:[#allocation5 + $0x390] sm:$0xff]  ;;  %v133_v1 = vld [vmem:[#allocation5 + $0x288] sm:$0xff]  ;;  %v148_v2 = vld [vmem:[#allocation5 + $0x300] sm:$0xff] }
  0x37   :  { %327 = vmatpush.msrb.mxu2 %v158_v21  ;;  %346 = vmatpush.msrb.mxu3 %v175_v22  ;;  %v165_v3 = vld [vmem:[#allocation5 + $0x388] sm:$0xff]  ;;  %v192_v5 = vld.sshfl [vmem:[#allocation1 + $0x30] sm:$0xff pattern:$0x73625140]  ;;  %v132_v6 = vld [vmem:[#allocation5 + $0x280] sm:$0xff] }
  0x38   :  { %288 = vmatpush.msrb.mxu0 %v125_v23  ;;  %307 = vmatpush.msrb.mxu1 %v142_v24  ;;  %v190_v4 = vld.sshfl [vmem:[#allocation1 + $0x20] sm:$0xff pattern:$0x73625140]  ;;  %v164_v7 = vld [vmem:[#allocation5 + $0x380] sm:$0xff] }
  0x39   :  { %328 = vmatpush.msrb.mxu2 %v157_v25  ;;  %347 = vmatpush.msrb.mxu3 %v174_v26  ;;  %v191_v8 = vld.sshfl [vmem:[#allocation1 + $0x28] sm:$0xff pattern:$0x73625140]  ;;  %v193_v9 = vld.sshfl [vmem:[#allocation1 + $0x38] sm:$0xff pattern:$0x73625140] }
  0x3a   :  { %289 = vmatpush.msrb.mxu0 %v124_v28  ;;  %308 = vmatpush.msrb.mxu1 %v141_v29  ;;  %v398_v28 = vld [vmem:[%s517_s2] ss:$0 sm:$0xff] }
  0x3b   :  { %329 = vmatpush.msrb.mxu2 %v156_v30  ;;  %348 = vmatpush.msrb.mxu3 %v173_v31  ;;  %v180_v24 = vld [vmem:[#allocation7] sm:$0x3] }
  0x3c   :  { %290 = vmatpush.msrb.mxu0 %v123_v32  ;;  %309 = vmatpush.msrb.mxu1 %v140_v33 }
  0x3d   :  { %330 = vmatpush.msrb.mxu2 %v155_v34  ;;  %349 = vmatpush.msrb.mxu3 %v172_v35 }
  0x3e   :  { %291 = vmatpush.msrb.mxu0 %v122_v36  ;;  %310 = vmatpush.msrb.mxu1 %v139_v37 }
  0x3f   :  { %331 = vmatpush.msrb.mxu2 %v154_v38  ;;  %350 = vmatpush.msrb.mxu3 %v171_v39 }
  0x40   :  { %292 = vmatpush.msrb.mxu0 %v121_v40  ;;  %311 = vmatpush.msrb.mxu1 %v138_v41 }
  0x41   :  { %332 = vmatpush.msrb.mxu2 %v153_v42  ;;  %351 = vmatpush.msrb.mxu3 %v170_v43 }
  0x42   :  { %258 = vmatmul.f32.vlgmr.msra.gmra.mxu2 %v188_v44  ;;  %293 = vmatpush.msrb.mxu0 %v120_v45 }
  0x43   :  { %312 = vmatpush.msrb.mxu1 %v137_v46  ;;  %333 = vmatpush.msrb.mxu2 %v152_v47 }
  0x44   :  { %352 = vmatpush.msrb.mxu3 %v169_v48  ;;  %218 = vmatmul.f32.vlgmr.msra.gmra.mxu0 %v186_v49 }
  0x45   :  { %278 = vmatmul.f32.vlgmr.msra.gmra.mxu3 %v189_v50  ;;  %294 = vmatpush.msrb.mxu0 %v119_v51 }
  0x46   :  { %313 = vmatpush.msrb.mxu1 %v136_v52  ;;  %334 = vmatpush.msrb.mxu2 %v151_v53 }
  0x47   :  { %353 = vmatpush.msrb.mxu3 %v168_v54  ;;  %238 = vmatmul.f32.vlgmr.msra.gmra.mxu1 %v187_v55 }
  0x48   :  { %295 = vmatpush.msrb.mxu0 %v118_v56  ;;  %314 = vmatpush.msrb.mxu1 %v135_v57 }
  0x49   :  { %335 = vmatpush.msrb.mxu2 %v150_v58  ;;  %354 = vmatpush.msrb.mxu3 %v167_v59 }
  0x4a   :  { %296 = vmatpush.msrb.mxu0 %v117_v60  ;;  %315 = vmatpush.msrb.mxu1 %v134_v61 }
  0x4b   :  { %336 = vmatpush.msrb.mxu2 %v149_v62  ;;  %355 = vmatpush.msrb.mxu3 %v166_v63 }
  0x4c   :  { %297 = vmatpush.msrb.mxu0 %v116_v0  ;;  %316 = vmatpush.msrb.mxu1 %v133_v1 }
  0x4d   :  { %337 = vmatpush.msrb.mxu2 %v148_v2  ;;  %356 = vmatpush.msrb.mxu3 %v165_v3 }
  0x4e   :  { %298 = vmatmul.f32.vlgmr.msrb.gmra.mxu0 %v190_v4  ;;  %338 = vmatmul.f32.vlgmr.msrb.gmra.mxu2 %v192_v5 }
  0x4f   :  { %317 = vmatpush.msrb.mxu1 %v132_v6  ;;  %357 = vmatpush.msrb.mxu3 %v164_v7 }
  0x50   :  { %318 = vmatmul.f32.vlgmr.msrb.gmra.mxu1 %v191_v8  ;;  %358 = vmatmul.f32.vlgmr.msrb.gmra.mxu3 %v193_v9 }
  0xc1   :  { %v219_v11 = vpop.f32.mrf.mxu0 }
  0xc4   :  { %v239_v12 = vpop.f32.mrf.mxu1 }
  0xc5   :  { %v240_v13 = vadd.f32 %v239_v12, %v219_v11  ;;  %v259_v14 = vpop.f32.mrf.mxu2 }
  0xc7   :  { %v260_v15 = vadd.f32 %v259_v14, %v240_v13 }
  0xc8   :  { %v279_v16 = vpop.f32.mrf.mxu3 }
  0xc9   :  { %v280_v17 = vadd.f32 %v279_v16, %v260_v15 }
  0xcb   :  { %v299_v18 = vpop.f32.mrf.mxu0 }
  0xcc   :  { %v300_v19 = vadd.f32 %v299_v18, %v280_v17 }
  0xcd   :  { %v319_v20 = vpop.f32.mrf.mxu1 }
  0xce   :  { %v320_v21 = vadd.f32 %v319_v20, %v300_v19 }
  0xd1   :  { %v339_v22 = vpop.f32.mrf.mxu2 }
  0xd2   :  { %v340_v23 = vadd.f32 %v339_v22, %v320_v21 }
  0xd3   :  { %v359_v25 = vpop.f32.mrf.mxu3 }
  0xd4   :  { %v360_v26 = vadd.f32 %v359_v25, %v340_v23 }
  0xd6   :  { %v362_v27 = vadd.f32 %v360_v26, %v180_v24 }
  0xd8   :  { %363 = vst [vmem:[#allocation7] sm:$0x3] %v362_v27 }
  0xdf   :  { %v367_v29 = vld [vmem:[#allocation7] sm:$0x3] }
  0xe0   :  { %v372_v30 = vadd.f32 %v398_v28, %v367_v29 }
  0xe2   :  { %373 = vst [vmem:[#allocation7] sm:$0x3] %v372_v30 }
  0xe3   :  { %384 = dma.vmem_to_hbm [thread:$0]  %s380_s25, 32, %s382_s28, [#allocation4]  }
  0xe4   :  { %475 = dma.done.wait [#allocation4], 32  }
  0xe5   :  { %476 = vsyncadd [#allocation4], 4294967264 }
  0xe6   :  { %389 = vsyncpa [#allocation3], 1 }
  0xe7   :  { %390 = vsyncpa [#allocation6], 1 }
  0xe8   :  { %391 = vsyncpa [#allocation4], 1 }

</bundles_post_ra>
